<compile_context>
chip_gen: v7x
topology: tpu7x:2x2x1
jax: 0.10.0
libtpu: 0.0.40
codegen_flags: <defaults>
</compile_context>

<pallas_src>
from typing import NamedTuple

import jax
import jax.numpy as jnp
from jax.experimental import pallas as pl
from jax.experimental.pallas import tpu as pltpu

LN_EPS = 1e-12

# Cached decision: does this jax build lower pl.Buffered(1) resident blocks?
_SINGLE_BUFFER_PARAMS_OK = None


def _round_up(x, m):
    return (x + m - 1) // m * m


def _vmem_capacity_bytes():
    """Per-TensorCore VMEM capacity; conservative 64 MiB (v7x) default."""
    try:
        cap = int(getattr(pltpu.get_tpu_info(), "vmem_capacity_bytes", 0))
        if cap > 0:
            return cap
    except Exception:  # hardware query unavailable; use conservative default
        pass
    return 64 * 1024 * 1024


class FeatureResizerParams(NamedTuple):
    wt: jax.Array      # (C1, C2_pad)  W^T, zero lane-padded, optionally bf16
    bias: jax.Array    # (1,  C2_pad)  f32, zero lane-padded
    gamma: jax.Array   # (1,  C2_pad)  f32, zero lane-padded
    beta: jax.Array    # (1,  C2_pad)  f32, zero lane-padded
    c1: int
    c2: int
    c2_pad: int


def prepare_feature_resizer_params(w, b, gamma, beta, *, compute_dtype=None):
    """One-time parameter prep (transpose + lane pad + optional bf16 cast).

    Call once at model-load time and reuse the result for every forward call
    so the hot path never relayouts W in HBM.
    """
    w = jnp.asarray(w)
    c2, c1 = w.shape
    c2_pad = _round_up(c2, 128)

    wt = w.T
    if compute_dtype is not None:
        wt = wt.astype(compute_dtype)
    b2 = jnp.asarray(b, jnp.float32).reshape(1, c2)
    g2 = jnp.asarray(gamma, jnp.float32).reshape(1, c2)
    be2 = jnp.asarray(beta, jnp.float32).reshape(1, c2)
    if c2_pad != c2:
        pad = ((0, 0), (0, c2_pad - c2))
        wt = jnp.pad(wt, pad)      # zero columns -> padded output lanes are 0
        b2 = jnp.pad(b2, pad)
        g2 = jnp.pad(g2, pad)
        be2 = jnp.pad(be2, pad)
    return FeatureResizerParams(wt, b2, g2, be2, int(c1), int(c2), int(c2_pad))


def _layer_norm_f32(y, gamma, beta, c2_true, c2_pad):
    """LayerNorm over the last axis in f32; padded lanes masked from variance."""
    inv_c2 = 1.0 / float(c2_true)
    # Padded lanes of y are exactly 0 (zero-padded W columns and bias), so the
    # sum over the padded width equals the sum over the true C2 width.
    mean = jnp.sum(y, axis=-1, keepdims=True) * inv_c2
    centered = y - mean
    if c2_pad != c2_true:
        lane = jax.lax.broadcasted_iota(jnp.int32, y.shape, y.ndim - 1)
        centered = jnp.where(lane < c2_true, centered, 0.0)
    var = jnp.sum(centered * centered, axis=-1, keepdims=True) * inv_c2
    return centered * jax.lax.rsqrt(var + LN_EPS) * gamma + beta


def _make_resident_kernel(c2_true, c2_pad, do_ln, compute_dtype):
    def kernel(x_ref, w_ref, b_ref, g_ref, be_ref, o_ref):
        x = x_ref[...]
        if compute_dtype is not None:
            x = x.astype(compute_dtype)       # bf16 MXU feed; acc stays f32
        y = jnp.dot(x, w_ref[...], preferred_element_type=jnp.float32)
        y = y + b_ref[...]
        if do_ln:
            y = _layer_norm_f32(y, g_ref[...], be_ref[...], c2_true, c2_pad)
        o_ref[...] = y.astype(o_ref.dtype)
    return kernel


def _make_ktiled_kernel(c2_true, c2_pad, do_ln, compute_dtype):
    def kernel(x_ref, w_ref, b_ref, g_ref, be_ref, o_ref, acc_ref):
        k = pl.program_id(1)

        @pl.when(k == 0)
        def _():
            acc_ref[...] = jnp.zeros_like(acc_ref)

        x = x_ref[...]
        if compute_dtype is not None:
            x = x.astype(compute_dtype)
        acc_ref[...] += jnp.dot(x, w_ref[...], preferred_element_type=jnp.float32)

        @pl.when(k == pl.num_programs(1) - 1)
        def _():
            y = acc_ref[...] + b_ref[...]
            if do_ln:
                y = _layer_norm_f32(y, g_ref[...], be_ref[...], c2_true, c2_pad)
            o_ref[...] = y.astype(o_ref.dtype)
    return kernel


def _choose_k_block(c1, c2_pad, w_isz, max_resident_bytes, k_block):
    """Pick a C1 tile (multiple of 128 that divides C1) when W^T can't stay resident."""
    if k_block is not None:
        if k_block >= c1:
            return None
        if c1 % k_block != 0 or k_block % 128 != 0:
            raise ValueError("k_block must be a multiple of 128 that divides C1")
        return int(k_block)
    if c1 * c2_pad * w_isz <= max_resident_bytes:
        return None
    best = None
    for tk in range(128, c1, 128):
        if c1 % tk == 0 and 2 * tk * c2_pad * w_isz <= max_resident_bytes:
            best = tk
    return best   # None -> no legal split; fall back to resident W^T


def _pick_tm(n_rows, per_row_bytes, resident_bytes, x_isz, o_isz, tm_request, budget):
    sub = 16 if min(x_isz, o_isz) < 4 else 8       # bf16 blocks need 16 sublanes
    tm = max(sub, _round_up(int(tm_request), sub))
    tm = min(tm, _round_up(n_rows, sub))            # don't over-tile tiny inputs
    max_tm = (budget - resident_bytes) // max(per_row_bytes, 1)
    max_tm = max(sub, (max_tm // sub) * sub)
    return min(tm, max_tm)


def feature_resizer(x, params: FeatureResizerParams, *, do_ln=True, tm=1024,
                    max_resident_bytes=16 << 20, k_block=None):
    """Apply FeatureResizer to x of shape (..., C1); returns (..., C2)."""
    global _SINGLE_BUFFER_PARAMS_OK

    c1, c2, c2_pad = params.c1, params.c2, params.c2_pad
    if x.shape[-1] != c1:
        raise ValueError(f"expected last dim {c1}, got {x.shape[-1]}")

    lead = x.shape[:-1]
    x2 = x.reshape(-1, c1)
    n = x2.shape[0]

    o_dtype = x.dtype
    x_isz = jnp.dtype(x.dtype).itemsize
    o_isz = jnp.dtype(o_dtype).itemsize
    w_isz = jnp.dtype(params.wt.dtype).itemsize
    compute_dtype = params.wt.dtype if w_isz < x_isz else None

    cap = _vmem_capacity_bytes()
    tile_budget = (cap * 5) // 8                      # ~40 MiB v7x, ~80 MiB v5e/v6e
    vmem_limit = int(max(min(cap - (16 << 20), (cap * 3) // 4), 32 << 20))

    tk = _choose_k_block(c1, c2_pad, w_isz, max_resident_bytes, k_block)

    if tk is None:
        # streamed x/out double-buffered + f32 matmul/LN intermediate
        per_row = 2 * c1 * x_isz + 2 * c2_pad * o_isz + 2 * c2_pad * 4
        resident = c1 * c2_pad * w_isz + 3 * c2_pad * 4
    else:
        per_row = 2 * tk * x_isz + 2 * c2_pad * o_isz + 3 * c2_pad * 4
        resident = 2 * tk * c2_pad * w_isz + 3 * c2_pad * 4   # W blocks double-buffered

    tm = _pick_tm(n, per_row, resident, x_isz, o_isz, tm, tile_budget)
    grid_rows = pl.cdiv(n, tm)

    cost = pl.CostEstimate(
        flops=int(2 * n * c1 * c2_pad),
        transcendentals=int(n if do_ln else 0),
        bytes_accessed=int(n * c1 * x_isz + n * c2_pad * o_isz
                           + params.wt.size * w_isz + 3 * c2_pad * 4),
    )
    compiler_params = pltpu.CompilerParams(
        # TODO(synk): on v7x, confirm the row axis is actually split across both
        # TensorCores by the "parallel" semantic; otherwise add a leading
        # CORE_PARALLEL axis / core_map split of the row range.
        dimension_semantics=("parallel",) if tk is None else ("parallel", "arbitrary"),
        vmem_limit_bytes=vmem_limit,
    )
    out_shape = jax.ShapeDtypeStruct((n, c2_pad), o_dtype)
    args = (x2, params.wt, params.bias, params.gamma, params.beta)

    if tk is None:
        kernel = _make_resident_kernel(c2, c2_pad, do_ln, compute_dtype)

        def build(single_buffer_params):
            def resident_spec(shape):
                if single_buffer_params:
                    # Block index never changes -> a single VMEM buffer suffices.
                    return pl.BlockSpec(shape, lambda i: (0, 0),
                                        pipeline_mode=pl.Buffered(1))
                return pl.BlockSpec(shape, lambda i: (0, 0))

            return pl.pallas_call(
                kernel,
                out_shape=out_shape,
                grid_spec=pltpu.PrefetchScalarGridSpec(
                    num_scalar_prefetch=0,
                    grid=(grid_rows,),
                    in_specs=[
                        pl.BlockSpec((tm, c1), lambda i: (i, 0)),   # streamed x rows
                        resident_spec((c1, c2_pad)),                # resident W^T
                        resident_spec((1, c2_pad)),                 # bias
                        resident_spec((1, c2_pad)),                 # LN gamma
                        resident_spec((1, c2_pad)),                 # LN beta
                    ],
                    out_specs=pl.BlockSpec((tm, c2_pad), lambda i: (i, 0)),
                ),
                compiler_params=compiler_params,
                cost_estimate=cost,
            )

        use_single = _SINGLE_BUFFER_PARAMS_OK is not False
        if use_single:
            try:
                out = build(True)(*args)
                _SINGLE_BUFFER_PARAMS_OK = True
            except (pltpu.LoweringException, NotImplementedError, ValueError,
                    jax.errors.JaxRuntimeError):
                # Narrow fallback: this build can't single-buffer resident blocks.
                # Remember the decision so later calls don't re-trace twice.
                _SINGLE_BUFFER_PARAMS_OK = False
                out = build(False)(*args)
        else:
            out = build(False)(*args)
    else:
        kernel = _make_ktiled_kernel(c2, c2_pad, do_ln, compute_dtype)
        out = pl.pallas_call(
            kernel,
            out_shape=out_shape,
            grid_spec=pltpu.PrefetchScalarGridSpec(
                num_scalar_prefetch=0,
                grid=(grid_rows, c1 // tk),
                in_specs=[
                    pl.BlockSpec((tm, tk), lambda i, k: (i, k)),       # x row/K tile
                    pl.BlockSpec((tk, c2_pad), lambda i, k: (k, 0)),   # streamed W^T
                    pl.BlockSpec((1, c2_pad), lambda i, k: (0, 0)),    # bias
                    pl.BlockSpec((1, c2_pad), lambda i, k: (0, 0)),    # LN gamma
                    pl.BlockSpec((1, c2_pad), lambda i, k: (0, 0)),    # LN beta
                ],
                out_specs=pl.BlockSpec((tm, c2_pad), lambda i, k: (i, 0)),
                scratch_shapes=[pltpu.VMEM((tm, c2_pad), jnp.float32)],
            ),
            compiler_params=compiler_params,
            cost_estimate=cost,
        )(*args)

    if c2_pad != c2:
        out = out[:, :c2]      # only needed when C2 isn't a multiple of 128
    return out.reshape(*lead, c2)


def feature_resizer_ref(x, w, b, gamma, beta, do_ln=True):
    y = jnp.einsum("...i,oi->...o", x, w) + b
    if do_ln:
        mean = jnp.mean(y, axis=-1, keepdims=True)
        var = jnp.mean(jnp.square(y - mean), axis=-1, keepdims=True)
        y = (y - mean) / jnp.sqrt(var + LN_EPS) * gamma + beta
    return y


if __name__ == "__main__":
    key = jax.random.PRNGKey(0)
    kx, kw, kb, kg, kbe, kx2, kw2, kb2 = jax.random.split(key, 8)

    # --- Test 1: resident-W path (batch=2, seq=8, C1=32 -> C2=64) ------------
    B, S, C1, C2 = 2, 8, 32, 64
    x = jax.random.normal(kx, (B, S, C1), dtype=jnp.float32)
    w = jax.random.uniform(kw, (C2, C1), minval=-1.0, maxval=1.0) / jnp.sqrt(C1)
    b = jax.random.uniform(kb, (C2,), minval=-1.0, maxval=1.0) / jnp.sqrt(C1)
    gamma = jnp.ones((C2,), jnp.float32) + 0.01 * jax.random.normal(kg, (C2,))
    beta = 0.01 * jax.random.normal(kbe, (C2,))

    params = prepare_feature_resizer_params(w, b, gamma, beta)   # prep once, reuse
    out = jax.block_until_ready(feature_resizer(x, params, do_ln=True))
    ref = feature_resizer_ref(x, w, b, gamma, beta, do_ln=True)
    assert out.shape == (B, S, C2)
    assert jnp.allclose(out, ref, atol=1e-4, rtol=1e-4), "resident path mismatch"

    # --- Test 2: K-tiled accumulator path (forced), C1=256 -> C2=64 ----------
    C1b = 256
    xb = jax.random.normal(kx2, (B, S, C1b), dtype=jnp.float32)
    wb = jax.random.uniform(kw2, (C2, C1b), minval=-1.0, maxval=1.0) / jnp.sqrt(C1b)
    bb = jax.random.uniform(kb2, (C2,), minval=-1.0, maxval=1.0) / jnp.sqrt(C1b)
    params_b = prepare_feature_resizer_params(wb, bb, gamma, beta)
    out_b = jax.block_until_ready(
        feature_resizer(xb, params_b, do_ln=True, k_block=128))
    ref_b = feature_resizer_ref(xb, wb, bb, gamma, beta, do_ln=True)
    assert out_b.shape == (B, S, C2)
    assert jnp.allclose(out_b, ref_b, atol=1e-4, rtol=1e-4), "K-tiled path mismatch"

    # --- Test 3: bf16 MXU feed (params pre-cast once; LN math stays f32) -----
    params_bf = prepare_feature_resizer_params(w, b, gamma, beta,
                                               compute_dtype=jnp.bfloat16)
    out_bf = jax.block_until_ready(feature_resizer(x, params_bf, do_ln=True))
    assert out_bf.shape == (B, S, C2)
    assert jnp.allclose(out_bf, ref, atol=1e-1, rtol=1e-1), "bf16 path mismatch"

    print("KERNEL_OK")
</pallas_src>

<mosaic_0001>
module attributes {stable_mosaic.version = 11 : i64} {
  func.func @kernel(%arg0: i32, %arg1: memref<16x32xf32, #tpu.memory_space<vmem>>, %arg2: memref<32x128xf32, #tpu.memory_space<vmem>>, %arg3: memref<1x128xf32, #tpu.memory_space<vmem>>, %arg4: memref<1x128xf32, #tpu.memory_space<vmem>>, %arg5: memref<1x128xf32, #tpu.memory_space<vmem>>, %arg6: memref<16x128xf32, #tpu.memory_space<vmem>>) attributes {dimension_semantics = [#tpu.dimension_semantics<parallel>], iteration_bounds = array<i64: 1>, scalar_prefetch = 0 : i64, scratch_operands = 0 : i64, tpu.core_type = #tpu.core_type<tc>, window_params = [{transform_indices = @transform_0, window_bounds = array<i64: 16, 32>}, {pipeline_mode = #tpu.pipeline_mode<synchronous>, transform_indices = @transform_1, window_bounds = array<i64: 32, 128>}, {pipeline_mode = #tpu.pipeline_mode<synchronous>, transform_indices = @transform_2, window_bounds = array<i64: 1, 128>}, {pipeline_mode = #tpu.pipeline_mode<synchronous>, transform_indices = @transform_3, window_bounds = array<i64: 1, 128>}, {pipeline_mode = #tpu.pipeline_mode<synchronous>, transform_indices = @transform_4, window_bounds = array<i64: 1, 128>}, {transform_indices = @transform_5, window_bounds = array<i64: 16, 128>}]} {
    %c0 = arith.constant 0 : index
    %c0_0 = arith.constant 0 : index
    %0 = vector.load %arg1[%c0, %c0_0] : memref<16x32xf32, #tpu.memory_space<vmem>>, vector<16x32xf32>
    %c0_1 = arith.constant 0 : index
    %c0_2 = arith.constant 0 : index
    %1 = vector.load %arg2[%c0_1, %c0_2] : memref<32x128xf32, #tpu.memory_space<vmem>>, vector<32x128xf32>
    %cst = arith.constant dense<0.000000e+00> : vector<16x128xf32>
    %2 = tpu.matmul %0, %1, %cst {dimension_numbers = #tpu.dot_dimension_numbers<[1], [0], [0], [1], [0, 0, 1, 1], [], []>} : vector<16x32xf32>, vector<32x128xf32>, vector<16x128xf32> -> vector<16x128xf32>
    %c0_3 = arith.constant 0 : index
    %c0_4 = arith.constant 0 : index
    %3 = vector.load %arg3[%c0_3, %c0_4] : memref<1x128xf32, #tpu.memory_space<vmem>>, vector<1x128xf32>
    %4 = vector.broadcast %3 : vector<1x128xf32> to vector<16x128xf32>
    %5 = arith.addf %2, %4 : vector<16x128xf32>
    %c0_5 = arith.constant 0 : index
    %c0_6 = arith.constant 0 : index
    %6 = vector.load %arg4[%c0_5, %c0_6] : memref<1x128xf32, #tpu.memory_space<vmem>>, vector<1x128xf32>
    %c0_7 = arith.constant 0 : index
    %c0_8 = arith.constant 0 : index
    %7 = vector.load %arg5[%c0_7, %c0_8] : memref<1x128xf32, #tpu.memory_space<vmem>>, vector<1x128xf32>
    %cst_9 = arith.constant dense<0.000000e+00> : vector<16xf32>
    %8 = vector.multi_reduction <add>, %5, %cst_9 [1] : vector<16x128xf32> to vector<16xf32>
    %9 = vector.shape_cast %8 : vector<16xf32> to vector<16x1xf32>
    %cst_10 = arith.constant 1.562500e-02 : f32
    %10 = vector.broadcast %cst_10 : f32 to vector<16x1xf32>
    %11 = arith.mulf %9, %10 : vector<16x1xf32>
    %12 = vector.broadcast %11 : vector<16x1xf32> to vector<16x128xf32>
    %13 = arith.subf %5, %12 : vector<16x128xf32>
    %14 = tpu.iota {dimensions = array<i32: 1>} : vector<16x128xi32>
    %c64_i32 = arith.constant 64 : i32
    %15 = vector.broadcast %c64_i32 : i32 to vector<16x128xi32>
    %16 = arith.cmpi slt, %14, %15 : vector<16x128xi32>
    %cst_11 = arith.constant 0.000000e+00 : f32
    %17 = vector.broadcast %cst_11 : f32 to vector<16x128xf32>
    %18 = arith.select %16, %13, %17 : vector<16x128xi1>, vector<16x128xf32>
    %19 = arith.mulf %18, %18 : vector<16x128xf32>
    %cst_12 = arith.constant dense<0.000000e+00> : vector<16xf32>
    %20 = vector.multi_reduction <add>, %19, %cst_12 [1] : vector<16x128xf32> to vector<16xf32>
    %21 = vector.shape_cast %20 : vector<16xf32> to vector<16x1xf32>
    %cst_13 = arith.constant 1.562500e-02 : f32
    %22 = vector.broadcast %cst_13 : f32 to vector<16x1xf32>
    %23 = arith.mulf %21, %22 : vector<16x1xf32>
    %cst_14 = arith.constant 9.99999996E-13 : f32
    %24 = vector.broadcast %cst_14 : f32 to vector<16x1xf32>
    %25 = arith.addf %23, %24 : vector<16x1xf32>
    %26 = math.rsqrt %25 : vector<16x1xf32>
    %27 = vector.broadcast %26 : vector<16x1xf32> to vector<16x128xf32>
    %28 = arith.mulf %18, %27 : vector<16x128xf32>
    %29 = vector.broadcast %6 : vector<1x128xf32> to vector<16x128xf32>
    %30 = arith.mulf %28, %29 : vector<16x128xf32>
    %31 = vector.broadcast %7 : vector<1x128xf32> to vector<16x128xf32>
    %32 = arith.addf %30, %31 : vector<16x128xf32>
    %c0_15 = arith.constant 0 : index
    %c0_16 = arith.constant 0 : index
    %33 = vector.load %arg6[%c0_15, %c0_16] : memref<16x128xf32, #tpu.memory_space<vmem>>, vector<16x128xf32>
    tpu.vector_store %arg6[%c0_15, %c0_16], %32 {strides = array<i32>} : memref<16x128xf32, #tpu.memory_space<vmem>>, vector<16x128xf32>,
    return
  }
  func.func @transform_0(%arg0: i32) -> (i32, i32) {
    %c0_i32 = arith.constant 0 : i32
    %c0_i32_0 = arith.constant 0 : i32
    return %arg0, %c0_i32 : i32, i32
  }
  func.func @transform_1(%arg0: i32) -> (i32, i32) {
    %c0_i32 = arith.constant 0 : i32
    %c0_i32_0 = arith.constant 0 : i32
    %c0_i32_1 = arith.constant 0 : i32
    return %c0_i32, %c0_i32_0 : i32, i32
  }
  func.func @transform_2(%arg0: i32) -> (i32, i32) {
    %c0_i32 = arith.constant 0 : i32
    %c0_i32_0 = arith.constant 0 : i32
    %c0_i32_1 = arith.constant 0 : i32
    return %c0_i32, %c0_i32_0 : i32, i32
  }
  func.func @transform_3(%arg0: i32) -> (i32, i32) {
    %c0_i32 = arith.constant 0 : i32
    %c0_i32_0 = arith.constant 0 : i32
    %c0_i32_1 = arith.constant 0 : i32
    return %c0_i32, %c0_i32_0 : i32, i32
  }
  func.func @transform_4(%arg0: i32) -> (i32, i32) {
    %c0_i32 = arith.constant 0 : i32
    %c0_i32_0 = arith.constant 0 : i32
    %c0_i32_1 = arith.constant 0 : i32
    return %c0_i32, %c0_i32_0 : i32, i32
  }
  func.func @transform_5(%arg0: i32) -> (i32, i32) {
    %c0_i32 = arith.constant 0 : i32
    %c0_i32_0 = arith.constant 0 : i32
    return %arg0, %c0_i32 : i32, i32
  }
}

</mosaic_0001>

<bundles_post_ra>
// kernel: tpu_custom_call.1
= control target key start
LH: loop header
LB: loop body
LE: loop exit
PB: predicated region body
PF: predicated region fallthrough
CT: control target
= control target key end

     0   :  { %10 = vsyncpa [#allocation3], 0  ;;  %s409_s0 = inlined_call_operand.hbm [shape: f32[16,32], index: 0, kind: input, shape index: {}]   ;;  %s410_s1 = inlined_call_operand.hbm [shape: f32[32,128], index: 1, kind: input, shape index: {}]   ;;  %s411_s2 = inlined_call_operand.vmem [shape: f32[1,128], index: 2, kind: input, shape index: {}]   ;;  %s412_s3 = inlined_call_operand.vmem [shape: f32[1,128], index: 3, kind: input, shape index: {}]   ;;  %s413_s4 = inlined_call_operand.vmem [shape: f32[1,128], index: 4, kind: input, shape index: {}]   ;;  %s414_s5 = inlined_call_operand.hbm [shape: f32[16,128], index: 5, kind: output, shape index: {}]  }
   0x1   :  { %11 = vsyncpa [#allocation6], 0 }
   0x2   :  { %12 = vsyncpa [#allocation4], 0  ;;  %s320_s18 = smov [#allocation2]   ;;  %s248_s22 = scalar_lea.hbm %s409_s0, 256 }
   0x3   :  { %s18_s19 = sshll.u32 %s320_s18, 4  ;;  %p249_p0 = scmp.ne.s32.totalorder %s409_s0, %s248_s22  ;;  %s19_s19 = int_to_ptr.vmem [resolvable:$true] %s18_s19 }
   0x4   :  { %p252_p1 = scmp.lt.u32.totalorder %s248_s22, %s409_s0 }
   0x6   :  { %p254_p2 = pnand %p252_p1, %p249_p0 }
   0x8   :  { %257 = shalt.err (!%p254_p2)
}
   0x9   :  { %s258_s27 = scalar_lea.vmem %s19_s19, 256  ;;  %p263_p4 = scmp.lt.s32.totalorder %s19_s19, %s19_s19 }
   0xa   :  { %p259_p3 = scmp.ne.s32.totalorder %s19_s19, %s258_s27  ;;  %p264_p5 = scmp.lt.s32.totalorder %s258_s27, %s258_s27 }
   0xc   :  { %p265_p6 = por %p264_p5, %p263_p4 }
   0xe   :  { %p266_p7 = pnand %p265_p6, %p259_p3 }
  0x10   :  { %269 = shalt.err (!%p266_p7)
}
  0x11   :  { %s321_s28 = smov 128   ;;  %s322_s29 = smov 8  }
  0x12   :  { %24 = dma.hbm_to_vmem [thread:$0]  %s409_s0, 256, %s19_s19, [#allocation3], %s321_s28, %s321_s28, %s322_s29  }
  0x13   :  { %s323_s7 = smov [#allocation5]   ;;  %s270_s11 = scalar_lea.hbm %s410_s1, 512 }
  0x14   :  { %s30_s8 = sshll.u32 %s323_s7, 4  ;;  %p271_p8 = scmp.ne.s32.totalorder %s410_s1, %s270_s11  ;;  %s31_s8 = int_to_ptr.vmem [resolvable:$true] %s30_s8 }
  0x15   :  { %p274_p9 = scmp.lt.u32.totalorder %s270_s11, %s410_s1 }
  0x17   :  { %p276_p10 = pnand %p274_p9, %p271_p8 }
  0x19   :  { %279 = shalt.err (!%p276_p10)
}
  0x1a   :  { %s280_s16 = scalar_lea.vmem %s31_s8, 512  ;;  %p285_p12 = scmp.lt.s32.totalorder %s31_s8, %s31_s8 }
  0x1b   :  { %p281_p11 = scmp.ne.s32.totalorder %s31_s8, %s280_s16  ;;  %p286_p13 = scmp.lt.s32.totalorder %s280_s16, %s280_s16 }
  0x1d   :  { %p287_p0 = por %p286_p13, %p285_p12 }
  0x1f   :  { %p288_p1 = pnand %p287_p0, %p281_p11 }
  0x21   :  { %291 = shalt.err (!%p288_p1)
}
  0x22   :  { %36 = dma.hbm_to_vmem [thread:$0]  %s410_s1, 512, %s31_s8, [#allocation6], %s321_s28, %s321_s28, %s322_s29  }
  0x23   :  { %314 = dma.done.wait [#allocation3], 256  }
  0x24   :  { %315 = vsyncadd [#allocation3], 4294967040 }
  0x25   :  { %316 = dma.done.wait [#allocation6], 512  }
  0x26   :  { %317 = vsyncadd [#allocation6], 4294966784  ;;  %vm62_vm0 = vcmask 261120   ;;  %v51_v0 = vld [vmem:[#allocation5] sm:$0xff]  ;;  %v52_v1 = vld [vmem:[#allocation5 + $0x8] sm:$0xff]  ;;  %v154_v13 = vlaneseq  ;;  %s324_s22 = smov [#allocation7]  }
  0x27   :  { %v53_v2 = vld [vmem:[#allocation5 + $0x10] sm:$0xff]  ;;  %v231_v3 = vpack.c.bf16 %v52_v1, %v51_v0  ;;  %v54_v4 = vld [vmem:[#allocation5 + $0x18] sm:$0xff]  ;;  %s196_s23 = sshll.u32 %s324_s22, 4  ;;  %s197_s23 = int_to_ptr.vmem [resolvable:$true] %s196_s23 }
  0x28   :  { %v49_v5 = vld [vmem:[#allocation2] sm:$0xff]  ;;  %v235_v6 = vpack.c.bf16 %v54_v4, %v53_v2  ;;  %v50_v7 = vld [vmem:[#allocation2 + $0x8] sm:$0xff]  ;;  %v155_v14 = vand.u32 127, %v154_v13  ;;  %s292_s24 = scalar_lea.vmem %s197_s23, 256  ;;  %p297_p3 = scmp.lt.s32.totalorder %s197_s23, %s197_s23 }
  0x29   :  { %228 = vmatprep.mubr.msk.f32.mxu0 %vm62_vm0, %v49_v5  ;;  %232 = vmatprep.subr.bf16.mxu0 %v231_v3  ;;  %v209_v8 = vld [vmem:[%s411_s2] ss:$0 sm:$0xff]  ;;  %p293_p2 = scmp.ne.s32.totalorder %s197_s23, %s292_s24  ;;  %p298_p4 = scmp.lt.s32.totalorder %s292_s24, %s292_s24 }
  0x2a   :  { %234 = vmatpush3.bf16.msra.mxu0 %v231_v3  ;;  %vm156_vm1 = vcmp.lt.s32.totalorder %v155_v14, 64  ;;  %v212_v32 = vld [vmem:[%s412_s3] ss:$0 sm:$0xff] }
  0x2b   :  { %236 = vmatprep.subr.bf16.mxu0 %v235_v6  ;;  %v213_v34 = vld [vmem:[%s413_s4] ss:$0 sm:$0xff]  ;;  %p299_p5 = por %p298_p4, %p297_p3 }
  0x2d   :  { %p300_p6 = pnand %p299_p5, %p293_p2 }
  0x2e   :  { %238 = vmatpush3.bf16.msra.mxu0 %v235_v6 }
  0x31   :  { %229 = vmatmul.mubr.msk.f32.vlgmr.msra.gmra.mrb[0].mxu0 %vm62_vm0, %v50_v7 }
 0x104   :  { %v230_v9 = vpop.f32.mrb[0].mxu0 }
 0x105   :  { %v135_v10 = vpop.f32.mrb[1].mxu0  ;;  %v141_v12 = vadd.f32 %v230_v9, %v209_v8 }
 0x106   :  { %v136_v11 = vadd.f32 %v209_v8, %v135_v10 }
 0x108   :  { %146 = vadd.xlane.f32.xlu0 %v136_v11 }
 0x10c   :  { %148 = vadd.xlane.f32.xlu0 %v141_v12 }
 0x195   :  { %v147_v15 = vpop.xlane.xlu0 %146 }
 0x196   :  { %v150_v16 = vmul.f32 0.015625, %v147_v15 }
 0x198   :  { %v152_v17 = vsub.f32 %v136_v11, %v150_v16 }
 0x199   :  { %v149_v18 = vpop.xlane.xlu0 %148 }
 0x19a   :  { %v151_v19 = vmul.f32 0.015625, %v149_v18  ;;  %v157_v20 = vsel %vm156_vm1, %v152_v17, 0.0 }
 0x19b   :  { %v159_v21 = vmul.f32 %v157_v20, %v157_v20 }
 0x19c   :  { %v153_v22 = vsub.f32 %v141_v12, %v151_v19 }
 0x19d   :  { %161 = vadd.xlane.f32.xlu1 %v159_v21 }
 0x19e   :  { %v158_v23 = vsel %vm156_vm1, %v153_v22, 0.0 }
 0x19f   :  { %v160_v24 = vmul.f32 %v158_v23, %v158_v23 }
 0x1a1   :  { %163 = vadd.xlane.f32.xlu1 %v160_v24 }
 0x22a   :  { %v162_v25 = vpop.xlane.xlu1 %161 }
 0x22b   :  { %v165_v26 = vmul.f32 0.015625, %v162_v25 }
 0x22d   :  { %v167_v27 = vadd.f32 1e-12, %v165_v26 }
 0x22e   :  { %v164_v28 = vpop.xlane.xlu1 %163 }
 0x22f   :  { %244 = vrsqrt.f32 %v167_v27  ;;  %v166_v29 = vmul.f32 0.015625, %v164_v28 }
 0x231   :  { %v168_v30 = vadd.f32 1e-12, %v166_v29 }
 0x233   :  { %246 = vrsqrt.f32 %v168_v30 }
 0x239   :  { %v245_v31 = vpop.eup %244 }
 0x23a   :  { %v171_v33 = vmul.f32 %v245_v31, %v157_v20 }
 0x23c   :  { %v179_v35 = vmul.f32 %v212_v32, %v171_v33 }
 0x23d   :  { %v247_v36 = vpop.eup %246 }
 0x23e   :  { %v172_v37 = vmul.f32 %v247_v36, %v158_v23  ;;  %v187_v38 = vadd.f32 %v213_v34, %v179_v35 }
 0x240   :  { %v180_v39 = vmul.f32 %v212_v32, %v172_v37  ;;  %189 = vst [vmem:[#allocation7] sm:$0xff] %v187_v38 }
 0x242   :  { %v188_v40 = vadd.f32 %v213_v34, %v180_v39 }
 0x244   :  { %190 = vst [vmem:[#allocation7 + $0x8] sm:$0xff] %v188_v40 }
 0x245   :  { %303 = shalt.err (!%p300_p6)
}
 0x246   :  { %s304_s25 = scalar_lea.hbm %s414_s5, 256 }
 0x247   :  { %p305_p7 = scmp.ne.s32.totalorder %s414_s5, %s304_s25  ;;  %p308_p8 = scmp.lt.u32.totalorder %s304_s25, %s414_s5 }
 0x249   :  { %p310_p9 = pnand %p308_p8, %p305_p7 }
 0x24b   :  { %313 = shalt.err (!%p310_p9)
}
 0x24c   :  { %202 = dma.vmem_to_hbm [thread:$0]  %s197_s23, 256, %s414_s5, [#allocation4], %s321_s28, %s321_s28, %s322_s29  }
 0x24d   :  { %318 = dma.done.wait [#allocation4], 256  }
 0x24e   :  { %319 = vsyncadd [#allocation4], 4294967040 }
 0x24f   :  { %206 = vsyncpa [#allocation3], 1 }
 0x250   :  { %207 = vsyncpa [#allocation6], 1 }
 0x251   :  { %208 = vsyncpa [#allocation4], 1 }

</bundles_post_ra>
